<compile_context>
chip_gen: v6e
topology: v6e:2x2x1
jax: 0.10.0
libtpu: 0.0.40
codegen_flags: <defaults>
</compile_context>

<pallas_src>
import jax
import jax.numpy as jnp
import numpy as np
from jax.experimental import pallas as pl
from jax.experimental.pallas import tpu as pltpu

# ----------------------------- model hyper-params ---------------------------
DECISION_DIM = 8      # input channels (stand-in for the qm9 grammar DECISION_DIM)
MAX_LEN      = 32     # sequence length
LATENT_DIM   = 16
BATCH        = 2

K1, C1 = 9, 9         # conv1: Conv1d(DECISION_DIM, 9, 9)
K2, C2 = 9, 9         # conv2: Conv1d(9, 9, 9)
K3, C3 = 11, 10       # conv3: Conv1d(9, 10, 11)
L0 = MAX_LEN
L1 = L0 - K1 + 1      # 24
L2 = L1 - K2 + 1      # 16
L3 = L2 - K3 + 1      # 6  (= last_conv_size)
FC_HIDDEN = 435
HEAD_DIM = 2 * LATENT_DIM     # fused mean||log_var width (un-padded)

# Sublane-aligned channel padding and lane-dense output padding.
CP0 = 8               # DECISION_DIM is already a multiple of 8
CP = 16               # conv1/2/3 output channels padded 9/9/10 -> 16
OUT_PAD = 128         # fused-head output columns: [mean | log_var | zeros]


# --------------------------------- kernel -----------------------------------
def cnn_encoder_kernel(x_ref,
                       w1_ref, b1_ref, w2_ref, b2_ref, w3_ref, b3_ref,
                       wfc_ref, bfc_ref, wh_ref, bh_ref,
                       out_ref):
    nb = out_ref.shape[1]          # batch-tile size (static)
    x = x_ref[0]                   # (CP0, L0*nb), lanes packed (l-major, n-minor)

    def conv_relu(h, w, b, k, lout):
        # im2col entirely in registers: because lanes are (l-major, n-minor),
        # tap j for every sample in the tile is one contiguous lane slice.
        # One MXU matmul per layer for the whole batch tile.
        col = jnp.concatenate(
            [h[:, j * nb:(j + lout) * nb] for j in range(k)], axis=0)
        y = jnp.dot(w, col, preferred_element_type=jnp.float32)
        return jnp.maximum(y + b, 0.0)          # bias (C,1) broadcast, once/layer

    h1 = conv_relu(x,  w1_ref[...], b1_ref[...], K1, L1)   # (CP, L1*nb)
    h2 = conv_relu(h1, w2_ref[...], b2_ref[...], K2, L2)   # (CP, L2*nb)
    h3 = conv_relu(h2, w3_ref[...], b3_ref[...], K3, L3)   # (CP, L3*nb)

    # Flatten in registers (no scratch): col_fc[l*CP + c, n] = h3[c, l*nb + n].
    # The matching (l-major, c-minor) FC weight layout is built in prepare_params.
    col_fc = jnp.concatenate(
        [h3[:, l * nb:(l + 1) * nb] for l in range(L3)], axis=0)   # (L3*CP, nb)
    flat = col_fc.T                                                # (nb, L3*CP)

    h = jnp.maximum(
        jnp.dot(flat, wfc_ref[...], preferred_element_type=jnp.float32)
        + bfc_ref[...], 0.0)                                       # (nb, 435)
    out_ref[0] = (jnp.dot(h, wh_ref[...], preferred_element_type=jnp.float32)
                  + bh_ref[...])                                   # (nb, 128) lane-dense


# ------------------------- parameter preparation ----------------------------
def prepare_params(params):
    """One-time re-layout of PyTorch-convention weights for the kernel."""
    (W1, b1), (W2, b2), (W3, b3), (Wfc, bfc), (Wm, bm), (Wv, bv) = params

    def conv_w(W, cin_p, cout_p):
        # (C_out, C_in, K) -> (cout_p, K*cin_p), tap-major / channel-minor,
        # zero-padded so im2col row blocks are sublane aligned.
        c_out, c_in, k = W.shape
        w = jnp.zeros((cout_p, k, cin_p), jnp.float32)
        w = w.at[:c_out, :, :c_in].set(jnp.transpose(W, (0, 2, 1)))
        return w.reshape(cout_p, k * cin_p)

    def conv_b(b, cout_p):
        return jnp.zeros((cout_p, 1), jnp.float32).at[:b.shape[0], 0].set(b)

    w1, b1p = conv_w(W1, CP0, CP), conv_b(b1, CP)
    w2, b2p = conv_w(W2, CP,  CP), conv_b(b2, CP)
    w3, b3p = conv_w(W3, CP,  CP), conv_b(b3, CP)

    # FC weight: rows ordered (l-major, c-minor) with channels padded to CP,
    # matching the in-kernel register flatten; equals torch flat @ Wfc.T.
    wfc3 = Wfc.reshape(FC_HIDDEN, C3, L3)                          # [f, c, l]
    wfc_r = jnp.zeros((L3, CP, FC_HIDDEN), jnp.float32)
    wfc_r = wfc_r.at[:, :C3, :].set(jnp.transpose(wfc3, (2, 1, 0)))  # [l, c, f]
    wfc_r = wfc_r.reshape(L3 * CP, FC_HIDDEN)
    bfc_r = bfc.reshape(1, FC_HIDDEN)

    # Fused, lane-dense heads: cols [0:16)=mean, [16:32)=log_var, rest zero.
    wh = jnp.zeros((FC_HIDDEN, OUT_PAD), jnp.float32)
    wh = wh.at[:, :LATENT_DIM].set(Wm.T).at[:, LATENT_DIM:HEAD_DIM].set(Wv.T)
    bh = jnp.zeros((1, OUT_PAD), jnp.float32)
    bh = bh.at[0, :LATENT_DIM].set(bm).at[0, LATENT_DIM:HEAD_DIM].set(bv)

    return (w1, b1p, w2, b2p, w3, b3p, wfc_r, bfc_r, wh, bh)


# --------------------------------- wrapper ----------------------------------
@jax.jit
def cnn_encoder_forward(x, prepared):
    """x: (N, DECISION_DIM, MAX_LEN) float32. Returns (z_mean, z_log_var)."""
    (w1, b1, w2, b2, w3, b3, wfc, bfc, wh, bh) = prepared
    N = x.shape[0]
    NB = N                         # batch-tile size (whole tiny batch per step)
    T = N // NB                    # grid length over batch tiles

    # Re-pack each batch tile so lanes are (l-major, n-minor): one contiguous
    # lane slice per conv tap inside the kernel.
    x_tiles = (x.reshape(T, NB, DECISION_DIM, MAX_LEN)
                 .transpose(0, 2, 3, 1)
                 .reshape(T, DECISION_DIM, MAX_LEN * NB))

    def full(a):                   # weight/bias: whole array, constant block
        return pl.BlockSpec(a.shape, lambda t: (0,) * a.ndim)

    out = pl.pallas_call(
        cnn_encoder_kernel,
        out_shape=jax.ShapeDtypeStruct((T, NB, OUT_PAD), jnp.float32),
        grid=(T,),
        in_specs=[pl.BlockSpec((1, DECISION_DIM, MAX_LEN * NB),
                               lambda t: (t, 0, 0)),
                  full(w1), full(b1), full(w2), full(b2), full(w3), full(b3),
                  full(wfc), full(bfc), full(wh), full(bh)],
        out_specs=pl.BlockSpec((1, NB, OUT_PAD), lambda t: (t, 0, 0)),
        compiler_params=pltpu.CompilerParams(
            dimension_semantics=("parallel",)),
    )(x_tiles, w1, b1, w2, b2, w3, b3, wfc, bfc, wh, bh)

    out = out.reshape(N, OUT_PAD)
    return out[:, :LATENT_DIM], out[:, LATENT_DIM:HEAD_DIM]


# ---------------------------- pure-JAX reference ----------------------------
def reference_forward(x, params):
    (W1, b1), (W2, b2), (W3, b3), (Wfc, bfc), (Wm, bm), (Wv, bv) = params

    def conv1d(x, w, b):
        out = jax.lax.conv_general_dilated(
            x, w, window_strides=(1,), padding='VALID',
            dimension_numbers=('NCH', 'OIH', 'NCH'),
            precision=jax.lax.Precision.HIGHEST)
        return out + b[None, :, None]

    h1 = jax.nn.relu(conv1d(x, W1, b1))
    h2 = jax.nn.relu(conv1d(h1, W2, b2))
    h3 = jax.nn.relu(conv1d(h2, W3, b3))
    flat = h3.reshape(x.shape[0], -1)
    h = jax.nn.relu(flat @ Wfc.T + bfc)
    return h @ Wm.T + bm, h @ Wv.T + bv


# --------------------------------- main -------------------------------------
def init_params(key):
    ks = jax.random.split(key, 12)
    s = 0.1
    W1 = s * jax.random.normal(ks[0], (C1, DECISION_DIM, K1), jnp.float32)
    b1 = s * jax.random.normal(ks[1], (C1,), jnp.float32)
    W2 = s * jax.random.normal(ks[2], (C2, C1, K2), jnp.float32)
    b2 = s * jax.random.normal(ks[3], (C2,), jnp.float32)
    W3 = s * jax.random.normal(ks[4], (C3, C2, K3), jnp.float32)
    b3 = s * jax.random.normal(ks[5], (C3,), jnp.float32)
    Wfc = s * jax.random.normal(ks[6], (FC_HIDDEN, L3 * C3), jnp.float32)
    bfc = s * jax.random.normal(ks[7], (FC_HIDDEN,), jnp.float32)
    Wm = s * jax.random.normal(ks[8], (LATENT_DIM, FC_HIDDEN), jnp.float32)
    bm = s * jax.random.normal(ks[9], (LATENT_DIM,), jnp.float32)
    Wv = s * jax.random.normal(ks[10], (LATENT_DIM, FC_HIDDEN), jnp.float32)
    bv = s * jax.random.normal(ks[11], (LATENT_DIM,), jnp.float32)
    return ((W1, b1), (W2, b2), (W3, b3), (Wfc, bfc), (Wm, bm), (Wv, bv))


if __name__ == "__main__":
    key = jax.random.PRNGKey(0)
    k_x, k_p = jax.random.split(key)
    x = jax.random.normal(k_x, (BATCH, DECISION_DIM, MAX_LEN), jnp.float32)
    params = init_params(k_p)

    prepared = prepare_params(params)          # one-time re-layout, outside jit
    z_mean, z_log_var = cnn_encoder_forward(x, prepared)
    jax.block_until_ready((z_mean, z_log_var))

    ref_mean, ref_log_var = reference_forward(x, params)
    np.testing.assert_allclose(np.asarray(z_mean), np.asarray(ref_mean),
                               rtol=1e-2, atol=1e-3)
    np.testing.assert_allclose(np.asarray(z_log_var), np.asarray(ref_log_var),
                               rtol=1e-2, atol=1e-3)

    assert z_mean.shape == (BATCH, LATENT_DIM)
    assert z_log_var.shape == (BATCH, LATENT_DIM)
    print("KERNEL_OK")
</pallas_src>

<mosaic_0001>
module attributes {stable_mosaic.version = 11 : i64} {
  func.func @cnn_encoder_kernel(%arg0: i32, %arg1: memref<1x8x64xf32, #tpu.memory_space<vmem>>, %arg2: memref<16x72xf32, #tpu.memory_space<vmem>>, %arg3: memref<16x1xf32, #tpu.memory_space<vmem>>, %arg4: memref<16x144xf32, #tpu.memory_space<vmem>>, %arg5: memref<16x1xf32, #tpu.memory_space<vmem>>, %arg6: memref<16x176xf32, #tpu.memory_space<vmem>>, %arg7: memref<16x1xf32, #tpu.memory_space<vmem>>, %arg8: memref<96x435xf32, #tpu.memory_space<vmem>>, %arg9: memref<1x435xf32, #tpu.memory_space<vmem>>, %arg10: memref<435x128xf32, #tpu.memory_space<vmem>>, %arg11: memref<1x128xf32, #tpu.memory_space<vmem>>, %arg12: memref<1x2x128xf32, #tpu.memory_space<vmem>>) attributes {dimension_semantics = [#tpu.dimension_semantics<parallel>], iteration_bounds = array<i64: 1>, scalar_prefetch = 0 : i64, scratch_operands = 0 : i64, tpu.core_type = #tpu.core_type<tc>, window_params = [{transform_indices = @transform_0, window_bounds = array<i64: 1, 8, 64>}, {pipeline_mode = #tpu.pipeline_mode<synchronous>, transform_indices = @transform_1, window_bounds = array<i64: 16, 72>}, {pipeline_mode = #tpu.pipeline_mode<synchronous>, transform_indices = @transform_2, window_bounds = array<i64: 16, 1>}, {pipeline_mode = #tpu.pipeline_mode<synchronous>, transform_indices = @transform_3, window_bounds = array<i64: 16, 144>}, {pipeline_mode = #tpu.pipeline_mode<synchronous>, transform_indices = @transform_4, window_bounds = array<i64: 16, 1>}, {pipeline_mode = #tpu.pipeline_mode<synchronous>, transform_indices = @transform_5, window_bounds = array<i64: 16, 176>}, {pipeline_mode = #tpu.pipeline_mode<synchronous>, transform_indices = @transform_6, window_bounds = array<i64: 16, 1>}, {pipeline_mode = #tpu.pipeline_mode<synchronous>, transform_indices = @transform_7, window_bounds = array<i64: 96, 435>}, {pipeline_mode = #tpu.pipeline_mode<synchronous>, transform_indices = @transform_8, window_bounds = array<i64: 1, 435>}, {pipeline_mode = #tpu.pipeline_mode<synchronous>, transform_indices = @transform_9, window_bounds = array<i64: 435, 128>}, {pipeline_mode = #tpu.pipeline_mode<synchronous>, transform_indices = @transform_10, window_bounds = array<i64: 1, 128>}, {transform_indices = @transform_11, window_bounds = array<i64: 1, 2, 128>}]} {
    %c0 = arith.constant 0 : index
    %c0_0 = arith.constant 0 : index
    %c0_1 = arith.constant 0 : index
    %0 = vector.load %arg1[%c0, %c0_0, %c0_1] : memref<1x8x64xf32, #tpu.memory_space<vmem>>, vector<1x8x64xf32>
    %1 = vector.shape_cast %0 : vector<1x8x64xf32> to vector<8x64xf32>
    %c0_2 = arith.constant 0 : index
    %c0_3 = arith.constant 0 : index
    %2 = vector.load %arg2[%c0_2, %c0_3] : memref<16x72xf32, #tpu.memory_space<vmem>>, vector<16x72xf32>
    %c0_4 = arith.constant 0 : index
    %c0_5 = arith.constant 0 : index
    %3 = vector.load %arg3[%c0_4, %c0_5] : memref<16x1xf32, #tpu.memory_space<vmem>>, vector<16x1xf32>
    %4 = vector.extract_strided_slice %1 {offsets = [0, 0], sizes = [8, 48], strides = [1, 1]} : vector<8x64xf32> to vector<8x48xf32>
    %5 = vector.extract_strided_slice %1 {offsets = [0, 2], sizes = [8, 48], strides = [1, 1]} : vector<8x64xf32> to vector<8x48xf32>
    %6 = vector.extract_strided_slice %1 {offsets = [0, 4], sizes = [8, 48], strides = [1, 1]} : vector<8x64xf32> to vector<8x48xf32>
    %7 = vector.extract_strided_slice %1 {offsets = [0, 6], sizes = [8, 48], strides = [1, 1]} : vector<8x64xf32> to vector<8x48xf32>
    %8 = vector.extract_strided_slice %1 {offsets = [0, 8], sizes = [8, 48], strides = [1, 1]} : vector<8x64xf32> to vector<8x48xf32>
    %9 = vector.extract_strided_slice %1 {offsets = [0, 10], sizes = [8, 48], strides = [1, 1]} : vector<8x64xf32> to vector<8x48xf32>
    %10 = vector.extract_strided_slice %1 {offsets = [0, 12], sizes = [8, 48], strides = [1, 1]} : vector<8x64xf32> to vector<8x48xf32>
    %11 = vector.extract_strided_slice %1 {offsets = [0, 14], sizes = [8, 48], strides = [1, 1]} : vector<8x64xf32> to vector<8x48xf32>
    %12 = vector.extract_strided_slice %1 {offsets = [0, 16], sizes = [8, 48], strides = [1, 1]} : vector<8x64xf32> to vector<8x48xf32>
    %13 = tpu.concatenate %4, %5, %6, %7, %8, %9, %10, %11, %12 in 0 : vector<8x48xf32>, vector<8x48xf32>, vector<8x48xf32>, vector<8x48xf32>, vector<8x48xf32>, vector<8x48xf32>, vector<8x48xf32>, vector<8x48xf32>, vector<8x48xf32> -> vector<72x48xf32>
    %cst = arith.constant dense<0.000000e+00> : vector<16x48xf32>
    %14 = tpu.matmul %2, %13, %cst {dimension_numbers = #tpu.dot_dimension_numbers<[1], [0], [0], [1], [0, 0, 1, 1], [], []>} : vector<16x72xf32>, vector<72x48xf32>, vector<16x48xf32> -> vector<16x48xf32>
    %15 = vector.broadcast %3 : vector<16x1xf32> to vector<16x48xf32>
    %16 = arith.addf %14, %15 : vector<16x48xf32>
    %cst_6 = arith.constant 0.000000e+00 : f32
    %17 = vector.broadcast %cst_6 : f32 to vector<16x48xf32>
    %18 = arith.maximumf %16, %17 : vector<16x48xf32>
    %c0_7 = arith.constant 0 : index
    %c0_8 = arith.constant 0 : index
    %19 = vector.load %arg4[%c0_7, %c0_8] : memref<16x144xf32, #tpu.memory_space<vmem>>, vector<16x144xf32>
    %c0_9 = arith.constant 0 : index
    %c0_10 = arith.constant 0 : index
    %20 = vector.load %arg5[%c0_9, %c0_10] : memref<16x1xf32, #tpu.memory_space<vmem>>, vector<16x1xf32>
    %21 = vector.extract_strided_slice %18 {offsets = [0, 0], sizes = [16, 32], strides = [1, 1]} : vector<16x48xf32> to vector<16x32xf32>
    %22 = vector.extract_strided_slice %18 {offsets = [0, 2], sizes = [16, 32], strides = [1, 1]} : vector<16x48xf32> to vector<16x32xf32>
    %23 = vector.extract_strided_slice %18 {offsets = [0, 4], sizes = [16, 32], strides = [1, 1]} : vector<16x48xf32> to vector<16x32xf32>
    %24 = vector.extract_strided_slice %18 {offsets = [0, 6], sizes = [16, 32], strides = [1, 1]} : vector<16x48xf32> to vector<16x32xf32>
    %25 = vector.extract_strided_slice %18 {offsets = [0, 8], sizes = [16, 32], strides = [1, 1]} : vector<16x48xf32> to vector<16x32xf32>
    %26 = vector.extract_strided_slice %18 {offsets = [0, 10], sizes = [16, 32], strides = [1, 1]} : vector<16x48xf32> to vector<16x32xf32>
    %27 = vector.extract_strided_slice %18 {offsets = [0, 12], sizes = [16, 32], strides = [1, 1]} : vector<16x48xf32> to vector<16x32xf32>
    %28 = vector.extract_strided_slice %18 {offsets = [0, 14], sizes = [16, 32], strides = [1, 1]} : vector<16x48xf32> to vector<16x32xf32>
    %29 = vector.extract_strided_slice %18 {offsets = [0, 16], sizes = [16, 32], strides = [1, 1]} : vector<16x48xf32> to vector<16x32xf32>
    %30 = tpu.concatenate %21, %22, %23, %24, %25, %26, %27, %28, %29 in 0 : vector<16x32xf32>, vector<16x32xf32>, vector<16x32xf32>, vector<16x32xf32>, vector<16x32xf32>, vector<16x32xf32>, vector<16x32xf32>, vector<16x32xf32>, vector<16x32xf32> -> vector<144x32xf32>
    %cst_11 = arith.constant dense<0.000000e+00> : vector<16x32xf32>
    %31 = tpu.matmul %19, %30, %cst_11 {dimension_numbers = #tpu.dot_dimension_numbers<[1], [0], [0], [1], [0, 0, 1, 1], [], []>} : vector<16x144xf32>, vector<144x32xf32>, vector<16x32xf32> -> vector<16x32xf32>
    %32 = vector.broadcast %20 : vector<16x1xf32> to vector<16x32xf32>
    %33 = arith.addf %31, %32 : vector<16x32xf32>
    %cst_12 = arith.constant 0.000000e+00 : f32
    %34 = vector.broadcast %cst_12 : f32 to vector<16x32xf32>
    %35 = arith.maximumf %33, %34 : vector<16x32xf32>
    %c0_13 = arith.constant 0 : index
    %c0_14 = arith.constant 0 : index
    %36 = vector.load %arg6[%c0_13, %c0_14] : memref<16x176xf32, #tpu.memory_space<vmem>>, vector<16x176xf32>
    %c0_15 = arith.constant 0 : index
    %c0_16 = arith.constant 0 : index
    %37 = vector.load %arg7[%c0_15, %c0_16] : memref<16x1xf32, #tpu.memory_space<vmem>>, vector<16x1xf32>
    %38 = vector.extract_strided_slice %35 {offsets = [0, 0], sizes = [16, 12], strides = [1, 1]} : vector<16x32xf32> to vector<16x12xf32>
    %39 = vector.extract_strided_slice %35 {offsets = [0, 2], sizes = [16, 12], strides = [1, 1]} : vector<16x32xf32> to vector<16x12xf32>
    %40 = vector.extract_strided_slice %35 {offsets = [0, 4], sizes = [16, 12], strides = [1, 1]} : vector<16x32xf32> to vector<16x12xf32>
    %41 = vector.extract_strided_slice %35 {offsets = [0, 6], sizes = [16, 12], strides = [1, 1]} : vector<16x32xf32> to vector<16x12xf32>
    %42 = vector.extract_strided_slice %35 {offsets = [0, 8], sizes = [16, 12], strides = [1, 1]} : vector<16x32xf32> to vector<16x12xf32>
    %43 = vector.extract_strided_slice %35 {offsets = [0, 10], sizes = [16, 12], strides = [1, 1]} : vector<16x32xf32> to vector<16x12xf32>
    %44 = vector.extract_strided_slice %35 {offsets = [0, 12], sizes = [16, 12], strides = [1, 1]} : vector<16x32xf32> to vector<16x12xf32>
    %45 = vector.extract_strided_slice %35 {offsets = [0, 14], sizes = [16, 12], strides = [1, 1]} : vector<16x32xf32> to vector<16x12xf32>
    %46 = vector.extract_strided_slice %35 {offsets = [0, 16], sizes = [16, 12], strides = [1, 1]} : vector<16x32xf32> to vector<16x12xf32>
    %47 = vector.extract_strided_slice %35 {offsets = [0, 18], sizes = [16, 12], strides = [1, 1]} : vector<16x32xf32> to vector<16x12xf32>
    %48 = vector.extract_strided_slice %35 {offsets = [0, 20], sizes = [16, 12], strides = [1, 1]} : vector<16x32xf32> to vector<16x12xf32>
    %49 = tpu.concatenate %38, %39, %40, %41, %42, %43, %44, %45, %46, %47, %48 in 0 : vector<16x12xf32>, vector<16x12xf32>, vector<16x12xf32>, vector<16x12xf32>, vector<16x12xf32>, vector<16x12xf32>, vector<16x12xf32>, vector<16x12xf32>, vector<16x12xf32>, vector<16x12xf32>, vector<16x12xf32> -> vector<176x12xf32>
    %cst_17 = arith.constant dense<0.000000e+00> : vector<16x12xf32>
    %50 = tpu.matmul %36, %49, %cst_17 {dimension_numbers = #tpu.dot_dimension_numbers<[1], [0], [0], [1], [0, 0, 1, 1], [], []>} : vector<16x176xf32>, vector<176x12xf32>, vector<16x12xf32> -> vector<16x12xf32>
    %51 = vector.broadcast %37 : vector<16x1xf32> to vector<16x12xf32>
    %52 = arith.addf %50, %51 : vector<16x12xf32>
    %cst_18 = arith.constant 0.000000e+00 : f32
    %53 = vector.broadcast %cst_18 : f32 to vector<16x12xf32>
    %54 = arith.maximumf %52, %53 : vector<16x12xf32>
    %55 = vector.extract_strided_slice %54 {offsets = [0, 0], sizes = [16, 2], strides = [1, 1]} : vector<16x12xf32> to vector<16x2xf32>
    %56 = vector.extract_strided_slice %54 {offsets = [0, 2], sizes = [16, 2], strides = [1, 1]} : vector<16x12xf32> to vector<16x2xf32>
    %57 = vector.extract_strided_slice %54 {offsets = [0, 4], sizes = [16, 2], strides = [1, 1]} : vector<16x12xf32> to vector<16x2xf32>
    %58 = vector.extract_strided_slice %54 {offsets = [0, 6], sizes = [16, 2], strides = [1, 1]} : vector<16x12xf32> to vector<16x2xf32>
    %59 = vector.extract_strided_slice %54 {offsets = [0, 8], sizes = [16, 2], strides = [1, 1]} : vector<16x12xf32> to vector<16x2xf32>
    %60 = vector.extract_strided_slice %54 {offsets = [0, 10], sizes = [16, 2], strides = [1, 1]} : vector<16x12xf32> to vector<16x2xf32>
    %61 = tpu.concatenate %55, %56, %57, %58, %59, %60 in 0 : vector<16x2xf32>, vector<16x2xf32>, vector<16x2xf32>, vector<16x2xf32>, vector<16x2xf32>, vector<16x2xf32> -> vector<96x2xf32>
    %62 = tpu.transpose %61, [1, 0] : vector<96x2xf32> -> vector<2x96xf32>
    %c0_19 = arith.constant 0 : index
    %c0_20 = arith.constant 0 : index
    %63 = vector.load %arg8[%c0_19, %c0_20] : memref<96x435xf32, #tpu.memory_space<vmem>>, vector<96x435xf32>
    %cst_21 = arith.constant dense<0.000000e+00> : vector<2x435xf32>
    %64 = tpu.matmul %62, %63, %cst_21 {dimension_numbers = #tpu.dot_dimension_numbers<[1], [0], [0], [1], [0, 0, 1, 1], [], []>} : vector<2x96xf32>, vector<96x435xf32>, vector<2x435xf32> -> vector<2x435xf32>
    %c0_22 = arith.constant 0 : index
    %c0_23 = arith.constant 0 : index
    %65 = vector.load %arg9[%c0_22, %c0_23] : memref<1x435xf32, #tpu.memory_space<vmem>>, vector<1x435xf32>
    %66 = vector.broadcast %65 : vector<1x435xf32> to vector<2x435xf32>
    %67 = arith.addf %64, %66 : vector<2x435xf32>
    %cst_24 = arith.constant 0.000000e+00 : f32
    %68 = vector.broadcast %cst_24 : f32 to vector<2x435xf32>
    %69 = arith.maximumf %67, %68 : vector<2x435xf32>
    %c0_25 = arith.constant 0 : index
    %c0_26 = arith.constant 0 : index
    %70 = vector.load %arg10[%c0_25, %c0_26] : memref<435x128xf32, #tpu.memory_space<vmem>>, vector<435x128xf32>
    %cst_27 = arith.constant dense<0.000000e+00> : vector<2x128xf32>
    %71 = tpu.matmul %69, %70, %cst_27 {dimension_numbers = #tpu.dot_dimension_numbers<[1], [0], [0], [1], [0, 0, 1, 1], [], []>} : vector<2x435xf32>, vector<435x128xf32>, vector<2x128xf32> -> vector<2x128xf32>
    %c0_28 = arith.constant 0 : index
    %c0_29 = arith.constant 0 : index
    %72 = vector.load %arg11[%c0_28, %c0_29] : memref<1x128xf32, #tpu.memory_space<vmem>>, vector<1x128xf32>
    %73 = vector.broadcast %72 : vector<1x128xf32> to vector<2x128xf32>
    %74 = arith.addf %71, %73 : vector<2x128xf32>
    %c0_30 = arith.constant 0 : index
    %c0_31 = arith.constant 0 : index
    %c0_32 = arith.constant 0 : index
    %75 = vector.load %arg12[%c0_30, %c0_31, %c0_32] : memref<1x2x128xf32, #tpu.memory_space<vmem>>, vector<1x2x128xf32>
    %76 = vector.shape_cast %75 : vector<1x2x128xf32> to vector<2x128xf32>
    %77 = vector.shape_cast %74 : vector<2x128xf32> to vector<1x2x128xf32>
    tpu.vector_store %arg12[%c0_30, %c0_31, %c0_32], %77 {strides = array<i32>} : memref<1x2x128xf32, #tpu.memory_space<vmem>>, vector<1x2x128xf32>,
    return
  }
  func.func @transform_0(%arg0: i32) -> (i32, i32, i32) {
    %c0_i32 = arith.constant 0 : i32
    %c0_i32_0 = arith.constant 0 : i32
    %c0_i32_1 = arith.constant 0 : i32
    return %arg0, %c0_i32, %c0_i32_0 : i32, i32, i32
  }
  func.func @transform_1(%arg0: i32) -> (i32, i32) {
    %c0_i32 = arith.constant 0 : i32
    %c0_i32_0 = arith.constant 0 : i32
    %c0_i32_1 = arith.constant 0 : i32
    return %c0_i32, %c0_i32_0 : i32, i32
  }
  func.func @transform_2(%arg0: i32) -> (i32, i32) {
    %c0_i32 = arith.constant 0 : i32
    %c0_i32_0 = arith.constant 0 : i32
    %c0_i32_1 = arith.constant 0 : i32
    return %c0_i32, %c0_i32_0 : i32, i32
  }
  func.func @transform_3(%arg0: i32) -> (i32, i32) {
    %c0_i32 = arith.constant 0 : i32
    %c0_i32_0 = arith.constant 0 : i32
    %c0_i32_1 = arith.constant 0 : i32
    return %c0_i32, %c0_i32_0 : i32, i32
  }
  func.func @transform_4(%arg0: i32) -> (i32, i32) {
    %c0_i32 = arith.constant 0 : i32
    %c0_i32_0 = arith.constant 0 : i32
    %c0_i32_1 = arith.constant 0 : i32
    return %c0_i32, %c0_i32_0 : i32, i32
  }
  func.func @transform_5(%arg0: i32) -> (i32, i32) {
    %c0_i32 = arith.constant 0 : i32
    %c0_i32_0 = arith.constant 0 : i32
    %c0_i32_1 = arith.constant 0 : i32
    return %c0_i32, %c0_i32_0 : i32, i32
  }
  func.func @transform_6(%arg0: i32) -> (i32, i32) {
    %c0_i32 = arith.constant 0 : i32
    %c0_i32_0 = arith.constant 0 : i32
    %c0_i32_1 = arith.constant 0 : i32
    return %c0_i32, %c0_i32_0 : i32, i32
  }
  func.func @transform_7(%arg0: i32) -> (i32, i32) {
    %c0_i32 = arith.constant 0 : i32
    %c0_i32_0 = arith.constant 0 : i32
    %c0_i32_1 = arith.constant 0 : i32
    return %c0_i32, %c0_i32_0 : i32, i32
  }
  func.func @transform_8(%arg0: i32) -> (i32, i32) {
    %c0_i32 = arith.constant 0 : i32
    %c0_i32_0 = arith.constant 0 : i32
    %c0_i32_1 = arith.constant 0 : i32
    return %c0_i32, %c0_i32_0 : i32, i32
  }
  func.func @transform_9(%arg0: i32) -> (i32, i32) {
    %c0_i32 = arith.constant 0 : i32
    %c0_i32_0 = arith.constant 0 : i32
    %c0_i32_1 = arith.constant 0 : i32
    return %c0_i32, %c0_i32_0 : i32, i32
  }
  func.func @transform_10(%arg0: i32) -> (i32, i32) {
    %c0_i32 = arith.constant 0 : i32
    %c0_i32_0 = arith.constant 0 : i32
    %c0_i32_1 = arith.constant 0 : i32
    return %c0_i32, %c0_i32_0 : i32, i32
  }
  func.func @transform_11(%arg0: i32) -> (i32, i32, i32) {
    %c0_i32 = arith.constant 0 : i32
    %c0_i32_0 = arith.constant 0 : i32
    %c0_i32_1 = arith.constant 0 : i32
    return %arg0, %c0_i32, %c0_i32_0 : i32, i32, i32
  }
}

</mosaic_0001>

<bundles_post_ra>
// kernel: cnn_encoder_forward.1
= control target key start
LH: loop header
LB: loop body
LE: loop exit
PB: predicated region body
PF: predicated region fallthrough
CT: control target
= control target key end

     0   :  { %16 = vsyncpa [#allocation3], 0  ;;  %s1474_s0 = inlined_call_operand.vmem [shape: f32[1,8,64], index: 0, kind: input, shape index: {}]   ;;  %s1475_s1 = inlined_call_operand.vmem [shape: f32[16,72], index: 1, kind: input, shape index: {}]   ;;  %s1476_s2 = inlined_call_operand.vmem [shape: f32[16,1], index: 2, kind: input, shape index: {}]   ;;  %s1477_s3 = inlined_call_operand.vmem [shape: f32[16,144], index: 3, kind: input, shape index: {}]   ;;  %s1478_s4 = inlined_call_operand.vmem [shape: f32[16,1], index: 4, kind: input, shape index: {}]   ;;  %s1479_s5 = inlined_call_operand.vmem [shape: f32[16,176], index: 5, kind: input, shape index: {}]   ;;  %s1480_s6 = inlined_call_operand.vmem [shape: f32[16,1], index: 6, kind: input, shape index: {}]   ;;  %s1481_s7 = inlined_call_operand.hbm [shape: f32[96,435], index: 7, kind: input, shape index: {}]   ;;  %s1482_s8 = inlined_call_operand.vmem [shape: f32[1,435], index: 8, kind: input, shape index: {}]   ;;  %s1483_s9 = inlined_call_operand.hbm [shape: f32[435,128], index: 9, kind: input, shape index: {}]   ;;  %s1484_s10 = inlined_call_operand.vmem [shape: f32[1,128], index: 10, kind: input, shape index: {}]   ;;  %s1485_s11 = inlined_call_operand.vmem [shape: f32[1,2,128], index: 11, kind: output, shape index: {}]  }
   0x1   :  { %17 = vsyncpa [#allocation5], 0  ;;  %s1145_s17 = smov [#allocation2]  }
   0x2   :  { %s37_s18 = sshll.u32 %s1145_s17, 4  ;;  %s38_s18 = int_to_ptr.vmem [resolvable:$true] %s37_s18 }
   0x3   :  { %s1109_s19 = scalar_lea.vmem %s38_s18, 6144  ;;  %p1114_p1 = scmp.lt.s32.totalorder %s38_s18, %s38_s18 }
   0x4   :  { %p1110_p0 = scmp.ne.s32.totalorder %s38_s18, %s1109_s19  ;;  %p1115_p2 = scmp.lt.s32.totalorder %s1109_s19, %s1109_s19 }
   0x6   :  { %p1116_p3 = por %p1115_p2, %p1114_p1 }
   0x8   :  { %p1117_p4 = pnand %p1116_p3, %p1110_p0 }
   0xa   :  { %1120 = shalt.err (!%p1117_p4)
}
   0xb   :  { %s1146_s20 = smov 512   ;;  %s1147_s21 = smov 32  }
   0xc   :  { %43 = dma.hbm_to_vmem [thread:$0]  %s1481_s7, 6144, %s38_s18, [#allocation3], %s1146_s20, %s1146_s20, %s1147_s21  }
   0xd   :  { %s1148_s24 = smov [#allocation4]  }
   0xe   :  { %s51_s25 = sshll.u32 %s1148_s24, 4  ;;  %s52_s25 = int_to_ptr.vmem [resolvable:$true] %s51_s25 }
   0xf   :  { %s1129_s26 = scalar_lea.vmem %s52_s25, 7040  ;;  %p1134_p6 = scmp.lt.s32.totalorder %s52_s25, %s52_s25 }
  0x10   :  { %p1130_p5 = scmp.ne.s32.totalorder %s52_s25, %s1129_s26  ;;  %p1135_p7 = scmp.lt.s32.totalorder %s1129_s26, %s1129_s26 }
  0x12   :  { %p1136_p8 = por %p1135_p7, %p1134_p6 }
  0x14   :  { %p1137_p9 = pnand %p1136_p8, %p1130_p5 }
  0x16   :  { %1140 = shalt.err (!%p1137_p9)
}
  0x17   :  { %s1149_s27 = smov 128   ;;  %s1150_s28 = smov 8  }
  0x18   :  { %57 = dma.hbm_to_vmem [thread:$0]  %s1483_s9, 7040, %s52_s25, [#allocation5], %s1149_s27, %s1149_s27, %s1150_s28  }
  0x19   :  { %1141 = dma.done.wait [#allocation3], 6144  }
  0x1a   :  { %1142 = vsyncadd [#allocation3], 4294961152 }
  0x1b   :  { %1143 = dma.done.wait [#allocation5], 7040  }
  0x1c   :  { %1144 = vsyncadd [#allocation5], 4294960256  ;;  %v66_v0 = vld [vmem:[%s1474_s0] sm:$0xff]  ;;  %s1151_s13 = smov 112   ;;  %s1152_s14 = smov 116   ;;  %vm106_vm0 = vcmask 588800  }
  0x1d   :  { %93 = vrot.lane.b32.xlu0 %v66_v0, %s1151_s13  ;;  %87 = vrot.lane.b32.xlu1 %v66_v0, %s1152_s14  ;;  %s1153_s15 = smov 114   ;;  %s1154_s16 = smov 118   ;;  %v67_v1 = vld [vmem:[%s1475_s1] sm:$0xff]  ;;  %v1157_v2 = vmov 0   ;;  %v70_v3 = vld [vmem:[%s1476_s2 + $0x8] sm:$0xff]  ;;  %v1160_v14 = vmov 0.0  }
  0x1e   :  { %1078 = vmatprep.mubr.msk.f32.mxu0 %vm106_vm0, %v67_v1  ;;  %s1155_s0 = smov 120   ;;  %s1156_s18 = smov 122   ;;  %1099 = vset.pattern.permute.xlu0 %v1157_v2  ;;  %v69_v4 = vld [vmem:[%s1476_s2] sm:$0xff]  ;;  %v68_v13 = vld [vmem:[%s1475_s1 + $0x8] sm:$0xff]  ;;  %vm256_vm1 = vcmask 130048   ;;  %v193_v43 = vld [vmem:[%s1477_s3 + $0x18] sm:$0xff] }
  0x1f   :  { %1100 = vset.pattern.permute.xlu1 %v1157_v2  ;;  %s1158_s19 = smov 124   ;;  %s1159_s20 = smov 126   ;;  %263 = vmatprep.subr.mxu1 %v1160_v14  ;;  %v191_v23 = vld [vmem:[%s1477_s3 + $0x8] sm:$0xff]  ;;  %v194_v25 = vld [vmem:[%s1478_s4] sm:$0xff]  ;;  %v192_v44 = vld [vmem:[%s1477_s3 + $0x10] sm:$0xff]  ;;  %vm418_vm2 = vcmask 392192  }
  0x20   :  { %1005 = vmatprep.mubr.msk.f32.mxu1 %vm256_vm1, %v191_v23  ;;  %v195_v24 = vld [vmem:[%s1478_s4 + $0x8] sm:$0xff]  ;;  %v190_v41 = vld [vmem:[%s1477_s3] sm:$0xff]  ;;  %s1161_s3 = smov 108   ;;  %vm636_vm3 = vcmask 785408   ;;  %vm852_vm4 = vcmask 1042432   ;;  %vm848_vm5 = vcmask 416768  }
  0x21   :  { %90 = vrot.lane.b32.xlu0 %v66_v0, %s1153_s15  ;;  %84 = vrot.lane.b32.xlu1 %v66_v0, %s1154_s16  ;;  %v341_v55 = vld [vmem:[%s1479_s5 + $0x8] sm:$0xff]  ;;  %v344_v57 = vld [vmem:[%s1480_s6] sm:$0xff] }
  0x22   :  { %v345_v56 = vld [vmem:[%s1480_s6 + $0x8] sm:$0xff] }
  0x25   :  { %81 = vrot.lane.b32.xlu0 %v66_v0, %s1155_s0  ;;  %78 = vrot.lane.b32.xlu1 %v66_v0, %s1156_s18 }
  0x29   :  { %75 = vrot.lane.b32.xlu0 %v66_v0, %s1158_s19  ;;  %72 = vrot.lane.b32.xlu1 %v66_v0, %s1159_s20 }
  0x2d   :  { %103 = vperm.xlu0 %1099, %v70_v3   ;;  %98 = vperm.xlu1 %1100, %v69_v4  }
  0x8f   :  { %v94_v5 = vpop.permute.xlu0 %93  ;;  %v88_v6 = vpop.permute.xlu1 %87 }
  0x90   :  { %1060 = vmatprep.subr.mxu0 %v94_v5 }
  0x91   :  { %1061 = vmatpush3.msra.mxu0 %v94_v5 }
  0x93   :  { %v91_v7 = vpop.permute.xlu0 %90  ;;  %v85_v8 = vpop.permute.xlu1 %84 }
  0x94   :  { %1062 = vmatprep.subr.mxu0 %v91_v7 }
  0x95   :  { %1063 = vmatpush3.msra.mxu0 %v91_v7 }
  0x96   :  { %1064 = vmatprep.subr.mxu0 %v88_v6 }
  0x97   :  { %1065 = vmatpush3.msra.mxu0 %v88_v6  ;;  %v82_v9 = vpop.permute.xlu0 %81  ;;  %v79_v10 = vpop.permute.xlu1 %78 }
  0x98   :  { %1066 = vmatprep.subr.mxu0 %v85_v8 }
  0x99   :  { %1067 = vmatpush3.msra.mxu0 %v85_v8 }
  0x9a   :  { %1068 = vmatprep.subr.mxu0 %v82_v9 }
  0x9b   :  { %1069 = vmatpush3.msra.mxu0 %v82_v9  ;;  %v76_v11 = vpop.permute.xlu0 %75  ;;  %v73_v12 = vpop.permute.xlu1 %72 }
  0x9c   :  { %1070 = vmatprep.subr.mxu0 %v79_v10 }
  0x9d   :  { %1071 = vmatpush3.msra.mxu0 %v79_v10 }
  0x9e   :  { %1072 = vmatprep.subr.mxu0 %v76_v11 }
  0x9f   :  { %1073 = vmatpush3.msra.mxu0 %v76_v11 }
  0xa0   :  { %1074 = vmatprep.subr.mxu0 %v73_v12 }
  0xa1   :  { %1075 = vmatpush3.msra.mxu0 %v73_v12 }
  0xa2   :  { %1076 = vmatprep.subr.mxu0 %v66_v0 }
  0xa3   :  { %1077 = vmatpush3.msra.mxu0 %v66_v0 }
  0xa4   :  { %1079 = vmatmul.mubr.msk.f32.vlgmr.msra.gmra.mxu0 %vm106_vm0, %v68_v13  ;;  %425 = vmatprep.subr.mxu0 %v1160_v14  ;;  %v340_v13 = vld [vmem:[%s1479_s5] sm:$0xff] }
  0xa5   :  { %1007 = vmatprep.mubr.msk.f32.mxu0 %vm418_vm2, %v341_v55  ;;  %v588_v55 = vld [vmem:[#allocation2 + $0xb0] sm:$0xff] }
  0xa8   :  { %v104_v15 = vpop.permute.xlu0 %103  ;;  %v99_v17 = vpop.permute.xlu1 %98 }
 0x164   :  { %v1080_v16 = vpop.f32.mrf.mxu0 }
 0x165   :  { %v185_v18 = vadd.f32 %v1080_v16, %v104_v15  ;;  %v343_v16 = vld [vmem:[%s1479_s5 + $0x18] sm:$0xff] }
 0x166   :  { %v179_v19 = vpop.f32.mrf.mxu0 }
 0x167   :  { %v1256_v20 = vmax.f32 %v185_v18, 0.0  ;;  %v180_v21 = vadd.f32 %v179_v19, %v99_v17  ;;  %v342_v17 = vld [vmem:[%s1479_s5 + $0x10] sm:$0xff] }
 0x169   :  { %v1258_v22 = vmax.f32 %v180_v21, 0.0  ;;  %236 = vrot.lane.b32.xlu1 %v1256_v20, %s1153_s15 }
 0x16b   :  { %234 = vrot.lane.b32.xlu0 %v1258_v22, %s1153_s15 }
 0x16d   :  { %230 = vrot.lane.b32.xlu1 %v1256_v20, %s1152_s14 }
 0x16f   :  { %228 = vrot.lane.b32.xlu0 %v1258_v22, %s1152_s14 }
 0x171   :  { %224 = vrot.lane.b32.xlu1 %v1256_v20, %s1154_s16 }
 0x173   :  { %222 = vrot.lane.b32.xlu0 %v1258_v22, %s1154_s16 }
 0x175   :  { %218 = vrot.lane.b32.xlu1 %v1256_v20, %s1155_s0 }
 0x177   :  { %216 = vrot.lane.b32.xlu0 %v1258_v22, %s1155_s0 }
 0x179   :  { %212 = vrot.lane.b32.xlu1 %v1256_v20, %s1156_s18 }
 0x17b   :  { %210 = vrot.lane.b32.xlu0 %v1258_v22, %s1156_s18 }
 0x17d   :  { %206 = vrot.lane.b32.xlu1 %v1256_v20, %s1158_s19 }
 0x17f   :  { %204 = vrot.lane.b32.xlu0 %v1258_v22, %s1158_s19 }
 0x181   :  { %200 = vrot.lane.b32.xlu1 %v1256_v20, %s1159_s20 }
 0x183   :  { %198 = vrot.lane.b32.xlu0 %v1258_v22, %s1159_s20 }
 0x185   :  { %242 = vrot.lane.b32.xlu1 %v1256_v20, %s1151_s13 }
 0x187   :  { %240 = vrot.lane.b32.xlu0 %v1258_v22, %s1151_s13 }
 0x189   :  { %253 = vperm.xlu1 %1100, %v195_v24  }
 0x18b   :  { %248 = vperm.xlu0 %1099, %v194_v25  }
 0x1db   :  { %v237_v26 = vpop.permute.xlu1 %236 }
 0x1dc   :  { %264 = vmatpush1.msra.mxu1 %v237_v26 }
 0x1dd   :  { %265 = vmatprep.subr.mxu1 %v1160_v14  ;;  %v235_v27 = vpop.permute.xlu0 %234 }
 0x1de   :  { %266 = vmatpush1.msra.mxu1 %v235_v27 }
 0x1df   :  { %v231_v28 = vpop.permute.xlu1 %230  ;;  %267 = vmatprep.subr.mxu1 %v1160_v14 }
 0x1e0   :  { %268 = vmatpush1.msra.mxu1 %v231_v28  ;;  %v611_v28 = vld [vmem:[#allocation2 + $0x168] sm:$0xff] }
 0x1e1   :  { %269 = vmatprep.subr.mxu1 %v1160_v14  ;;  %v229_v29 = vpop.permute.xlu0 %228 }
 0x1e2   :  { %270 = vmatpush1.msra.mxu1 %v229_v29  ;;  %v613_v29 = vld [vmem:[#allocation2 + $0x178] sm:$0xff] }
 0x1e3   :  { %v225_v30 = vpop.permute.xlu1 %224  ;;  %271 = vmatprep.subr.mxu1 %v1160_v14 }
 0x1e4   :  { %272 = vmatpush1.msra.mxu1 %v225_v30  ;;  %v610_v30 = vld [vmem:[#allocation2 + $0x160] sm:$0xff] }
 0x1e5   :  { %273 = vmatprep.subr.mxu1 %v1160_v14  ;;  %v223_v31 = vpop.permute.xlu0 %222 }
 0x1e6   :  { %274 = vmatpush1.msra.mxu1 %v223_v31  ;;  %v612_v31 = vld [vmem:[#allocation2 + $0x170] sm:$0xff] }
 0x1e7   :  { %v219_v32 = vpop.permute.xlu1 %218  ;;  %275 = vmatprep.subr.mxu1 %v1160_v14 }
 0x1e8   :  { %276 = vmatpush1.msra.mxu1 %v219_v32  ;;  %v607_v32 = vld [vmem:[#allocation2 + $0x148] sm:$0xff] }
 0x1e9   :  { %277 = vmatprep.subr.mxu1 %v1160_v14  ;;  %v217_v33 = vpop.permute.xlu0 %216 }
 0x1ea   :  { %278 = vmatpush1.msra.mxu1 %v217_v33  ;;  %v609_v33 = vld [vmem:[#allocation2 + $0x158] sm:$0xff] }
 0x1eb   :  { %v213_v34 = vpop.permute.xlu1 %212  ;;  %279 = vmatprep.subr.mxu1 %v1160_v14 }
 0x1ec   :  { %280 = vmatpush1.msra.mxu1 %v213_v34  ;;  %v606_v34 = vld [vmem:[#allocation2 + $0x140] sm:$0xff] }
 0x1ed   :  { %281 = vmatprep.subr.mxu1 %v1160_v14  ;;  %v211_v35 = vpop.permute.xlu0 %210 }
 0x1ee   :  { %282 = vmatpush1.msra.mxu1 %v211_v35  ;;  %v608_v35 = vld [vmem:[#allocation2 + $0x150] sm:$0xff] }
 0x1ef   :  { %v207_v36 = vpop.permute.xlu1 %206  ;;  %283 = vmatprep.subr.mxu1 %v1160_v14 }
 0x1f0   :  { %284 = vmatpush1.msra.mxu1 %v207_v36  ;;  %v603_v36 = vld [vmem:[#allocation2 + $0x128] sm:$0xff] }
 0x1f1   :  { %285 = vmatprep.subr.mxu1 %v1160_v14  ;;  %v205_v37 = vpop.permute.xlu0 %204 }
 0x1f2   :  { %286 = vmatpush1.msra.mxu1 %v205_v37  ;;  %v605_v37 = vld [vmem:[#allocation2 + $0x138] sm:$0xff] }
 0x1f3   :  { %v201_v38 = vpop.permute.xlu1 %200  ;;  %287 = vmatprep.subr.mxu1 %v1160_v14 }
 0x1f4   :  { %288 = vmatpush1.msra.mxu1 %v201_v38  ;;  %v602_v38 = vld [vmem:[#allocation2 + $0x120] sm:$0xff] }
 0x1f5   :  { %289 = vmatprep.subr.mxu1 %v1160_v14  ;;  %v199_v39 = vpop.permute.xlu0 %198 }
 0x1f6   :  { %290 = vmatpush1.msra.mxu1 %v199_v39  ;;  %v604_v39 = vld [vmem:[#allocation2 + $0x130] sm:$0xff] }
 0x1f7   :  { %291 = vmatprep.subr.mxu1 %v1160_v14  ;;  %v243_v40 = vpop.permute.xlu1 %242 }
 0x1f8   :  { %292 = vmatpush1.msra.mxu1 %v1256_v20 }
 0x1f9   :  { %293 = vmatprep.subr.mxu1 %v1160_v14  ;;  %v241_v42 = vpop.permute.xlu0 %240 }
 0x1fa   :  { %294 = vmatpush1.msra.mxu1 %v1258_v22 }
 0x1fb   :  { %323 = vmatprep.subr.mxu1 %v1160_v14 }
 0x1fc   :  { %324 = vmatpush2.msra.mxu1 %v243_v40  ;;  %v599_v40 = vld [vmem:[#allocation2 + $0x108] sm:$0xff] }
 0x1fd   :  { %325 = vmatprep.subr.mxu1 %v1160_v14 }
 0x1fe   :  { %326 = vmatpush2.msra.mxu1 %v241_v42  ;;  %v598_v42 = vld [vmem:[#allocation2 + $0x100] sm:$0xff] }
 0x1ff   :  { %328 = vmatmul.mubr.f32.vlgmr.msra.gmra.mxu1 %v190_v41  ;;  %719 = vmatprep.subr.mxu1 %v613_v29  ;;  %v601_v41 = vld [vmem:[#allocation2 + $0x118] sm:$0xff]  ;;  %v800_v29 = vld [vmem:[#allocation4 + $0x70] sm:$0xff] }
 0x200   :  { %1006 = vmatprep.mubr.msk.f32.mxu1 %vm256_vm1, %v193_v43  ;;  %720 = vmatpush1.msra.mxu1 %v612_v31  ;;  %v600_v43 = vld [vmem:[#allocation2 + $0x110] sm:$0xff]  ;;  %v831_v31 = vld [vmem:[#allocation4 + $0x168] sm:$0xff] }
 0x201   :  { %721 = vmatprep.subr.mxu1 %v609_v33  ;;  %v814_v33 = vld [vmem:[#allocation4 + $0xe0] sm:$0xff] }
 0x202   :  { %722 = vmatpush1.msra.mxu1 %v608_v35  ;;  %v798_v35 = vld [vmem:[#allocation4 + $0x60] sm:$0xff] }
 0x203   :  { %333 = vmatmul.mubr.f32.gmra.mxu1 %v192_v44  ;;  %723 = vmatprep.subr.mxu1 %v605_v37  ;;  %v595_v44 = vld [vmem:[#allocation2 + $0xe8] sm:$0xff]  ;;  %v829_v37 = vld [vmem:[#allocation4 + $0x158] sm:$0xff] }
 0x204   :  { %775 = vmatprep.mubr.f32.mxu1 %v1160_v14  ;;  %v254_v50 = vpop.permute.xlu1 %253  ;;  %724 = vmatpush1.msra.mxu1 %v604_v39  ;;  %v812_v39 = vld [vmem:[#allocation4 + $0xd0] sm:$0xff] }
 0x205   :  { %725 = vmatprep.subr.mxu1 %v601_v41  ;;  %v796_v41 = vld [vmem:[#allocation4 + $0x50] sm:$0xff] }
 0x206   :  { %v249_v45 = vpop.permute.xlu0 %248  ;;  %726 = vmatpush1.msra.mxu1 %v600_v43  ;;  %v827_v43 = vld [vmem:[#allocation4 + $0x148] sm:$0xff] }
 0x2bf   :  { %v329_v46 = vpop.f32.mrf.mxu1 }
 0x2c0   :  { %v330_v47 = vadd.f32 %v329_v46, %v249_v45  ;;  %v597_v45 = vld [vmem:[#allocation2 + $0xf8] sm:$0xff]  ;;  %v594_v46 = vld [vmem:[#allocation2 + $0xe0] sm:$0xff] }
 0x2c1   :  { %v331_v48 = vpop.f32.mrf.mxu1  ;;  %727 = vmatprep.subr.mxu1 %v597_v45  ;;  %v810_v45 = vld [vmem:[#allocation4 + $0xc0] sm:$0xff] }
 0x2c2   :  { %v1332_v49 = vmax.f32 %v330_v47, 0.0  ;;  %v596_v47 = vld [vmem:[#allocation2 + $0xf0] sm:$0xff]  ;;  %v591_v48 = vld [vmem:[#allocation2 + $0xc8] sm:$0xff] }
 0x2c3   :  { %v334_v51 = vpop.f32.mrf.mxu1  ;;  %728 = vmatpush1.msra.mxu1 %v596_v47  ;;  %v794_v47 = vld [vmem:[#allocation4 + $0x40] sm:$0xff] }
 0x2c4   :  { %v335_v52 = vadd.f32 %v334_v51, %v254_v50  ;;  %384 = vrot.lane.b32.xlu0 %v1332_v49, %s1153_s15  ;;  %v590_v50 = vld [vmem:[#allocation2 + $0xc0] sm:$0xff]  ;;  %v592_v51 = vld [vmem:[#allocation2 + $0xd0] sm:$0xff] }
 0x2c5   :  { %v336_v53 = vpop.f32.mrf.mxu1 }
 0x2c6   :  { %v1336_v54 = vmax.f32 %v335_v52, 0.0  ;;  %v587_v52 = vld [vmem:[#allocation2 + $0xa8] sm:$0xff]  ;;  %v589_v53 = vld [vmem:[#allocation2 + $0xb8] sm:$0xff] }
 0x2c8   :  { %386 = vrot.lane.b32.xlu1 %v1336_v54, %s1153_s15  ;;  %378 = vrot.lane.b32.xlu0 %v1332_v49, %s1152_s14 }
 0x2cc   :  { %380 = vrot.lane.b32.xlu1 %v1336_v54, %s1152_s14  ;;  %372 = vrot.lane.b32.xlu0 %v1332_v49, %s1154_s16  ;;  %s1162_s14 = smov 110  }
 0x2d0   :  { %374 = vrot.lane.b32.xlu1 %v1336_v54, %s1154_s16  ;;  %366 = vrot.lane.b32.xlu0 %v1332_v49, %s1155_s0 }
 0x2d4   :  { %368 = vrot.lane.b32.xlu1 %v1336_v54, %s1155_s0  ;;  %360 = vrot.lane.b32.xlu0 %v1332_v49, %s1156_s18 }
 0x2d8   :  { %362 = vrot.lane.b32.xlu1 %v1336_v54, %s1156_s18  ;;  %354 = vrot.lane.b32.xlu0 %v1332_v49, %s1158_s19 }
 0x2dc   :  { %356 = vrot.lane.b32.xlu1 %v1336_v54, %s1158_s19  ;;  %348 = vrot.lane.b32.xlu0 %v1332_v49, %s1159_s20 }
 0x2e0   :  { %350 = vrot.lane.b32.xlu1 %v1336_v54, %s1159_s20  ;;  %402 = vrot.lane.b32.xlu0 %v1332_v49, %s1161_s3 }
 0x2e4   :  { %404 = vrot.lane.b32.xlu1 %v1336_v54, %s1161_s3  ;;  %396 = vrot.lane.b32.xlu0 %v1332_v49, %s1162_s14 }
 0x2e8   :  { %398 = vrot.lane.b32.xlu1 %v1336_v54, %s1162_s14  ;;  %390 = vrot.lane.b32.xlu0 %v1332_v49, %s1151_s13 }
 0x2ec   :  { %392 = vrot.lane.b32.xlu1 %v1336_v54, %s1151_s13  ;;  %415 = vperm.xlu0 %1099, %v345_v56   ;;  %v583_v56 = vld [vmem:[#allocation2 + $0x88] sm:$0xff] }
 0x2f0   :  { %410 = vperm.xlu1 %1100, %v344_v57   ;;  %v585_v57 = vld [vmem:[#allocation2 + $0x98] sm:$0xff] }
 0x336   :  { %v385_v58 = vpop.permute.xlu0 %384 }
 0x33a   :  { %v387_v59 = vpop.permute.xlu1 %386  ;;  %v379_v60 = vpop.permute.xlu0 %378 }
 0x33b   :  { %426 = vmatpush1.msra.mxu0 %v387_v59  ;;  %v584_v59 = vld [vmem:[#allocation2 + $0x90] sm:$0xff] }
 0x33c   :  { %427 = vmatprep.subr.mxu0 %v1160_v14 }
 0x33d   :  { %428 = vmatpush1.msra.mxu0 %v385_v58  ;;  %v582_v58 = vld [vmem:[#allocation2 + $0x80] sm:$0xff] }
 0x33e   :  { %v381_v61 = vpop.permute.xlu1 %380  ;;  %429 = vmatprep.subr.mxu0 %v1160_v14  ;;  %v373_v62 = vpop.permute.xlu0 %372 }
 0x33f   :  { %430 = vmatpush1.msra.mxu0 %v381_v61  ;;  %v581_v61 = vld [vmem:[#allocation2 + $0x78] sm:$0xff] }
 0x340   :  { %431 = vmatprep.subr.mxu0 %v1160_v14 }
 0x341   :  { %432 = vmatpush1.msra.mxu0 %v379_v60  ;;  %v579_v60 = vld [vmem:[#allocation2 + $0x68] sm:$0xff] }
 0x342   :  { %v375_v63 = vpop.permute.xlu1 %374  ;;  %433 = vmatprep.subr.mxu0 %v1160_v14  ;;  %v367_v0 = vpop.permute.xlu0 %366 }
 0x343   :  { %434 = vmatpush1.msra.mxu0 %v375_v63  ;;  %v580_v63 = vld [vmem:[#allocation2 + $0x70] sm:$0xff] }
 0x344   :  { %435 = vmatprep.subr.mxu0 %v1160_v14 }
 0x345   :  { %436 = vmatpush1.msra.mxu0 %v373_v62  ;;  %v578_v62 = vld [vmem:[#allocation2 + $0x60] sm:$0xff] }
 0x346   :  { %v369_v1 = vpop.permute.xlu1 %368  ;;  %437 = vmatprep.subr.mxu0 %v1160_v14  ;;  %v361_v2 = vpop.permute.xlu0 %360 }
 0x347   :  { %438 = vmatpush1.msra.mxu0 %v369_v1  ;;  %v577_v1 = vld [vmem:[#allocation2 + $0x58] sm:$0xff] }
 0x348   :  { %439 = vmatprep.subr.mxu0 %v1160_v14 }
 0x349   :  { %440 = vmatpush1.msra.mxu0 %v367_v0  ;;  %v575_v0 = vld [vmem:[#allocation2 + $0x48] sm:$0xff] }
 0x34a   :  { %v363_v3 = vpop.permute.xlu1 %362  ;;  %441 = vmatprep.subr.mxu0 %v1160_v14  ;;  %v355_v4 = vpop.permute.xlu0 %354 }
 0x34b   :  { %442 = vmatpush1.msra.mxu0 %v363_v3  ;;  %v576_v3 = vld [vmem:[#allocation2 + $0x50] sm:$0xff] }
 0x34c   :  { %443 = vmatprep.subr.mxu0 %v1160_v14 }
 0x34d   :  { %444 = vmatpush1.msra.mxu0 %v361_v2  ;;  %v574_v2 = vld [vmem:[#allocation2 + $0x40] sm:$0xff] }
 0x34e   :  { %v357_v5 = vpop.permute.xlu1 %356  ;;  %445 = vmatprep.subr.mxu0 %v1160_v14  ;;  %v349_v6 = vpop.permute.xlu0 %348 }
 0x34f   :  { %446 = vmatpush1.msra.mxu0 %v357_v5  ;;  %v573_v5 = vld [vmem:[#allocation2 + $0x38] sm:$0xff] }
 0x350   :  { %447 = vmatprep.subr.mxu0 %v1160_v14 }
 0x351   :  { %448 = vmatpush1.msra.mxu0 %v355_v4  ;;  %v571_v4 = vld [vmem:[#allocation2 + $0x28] sm:$0xff] }
 0x352   :  { %v351_v7 = vpop.permute.xlu1 %350  ;;  %449 = vmatprep.subr.mxu0 %v1160_v14  ;;  %v403_v9 = vpop.permute.xlu0 %402 }
 0x353   :  { %450 = vmatpush1.msra.mxu0 %v351_v7  ;;  %v572_v7 = vld [vmem:[#allocation2 + $0x30] sm:$0xff] }
 0x354   :  { %451 = vmatprep.subr.mxu0 %v1160_v14 }
 0x355   :  { %452 = vmatpush1.msra.mxu0 %v349_v6  ;;  %v570_v6 = vld [vmem:[#allocation2 + $0x20] sm:$0xff] }
 0x356   :  { %v405_v8 = vpop.permute.xlu1 %404  ;;  %453 = vmatprep.subr.mxu0 %v1160_v14  ;;  %v397_v11 = vpop.permute.xlu0 %396 }
 0x357   :  { %454 = vmatpush1.msra.mxu0 %v1336_v54  ;;  %v586_v54 = vld [vmem:[#allocation2 + $0xa0] sm:$0xff] }
 0x358   :  { %455 = vmatprep.subr.mxu0 %v1160_v14 }
 0x359   :  { %456 = vmatpush1.msra.mxu0 %v1332_v49  ;;  %v593_v49 = vld [vmem:[#allocation2 + $0xd8] sm:$0xff] }
 0x35a   :  { %477 = vmatprep.subr.mxu0 %v1160_v14  ;;  %v399_v10 = vpop.permute.xlu1 %398  ;;  %v391_v15 = vpop.permute.xlu0 %390  ;;  %729 = vmatprep.subr.mxu1 %v593_v49  ;;  %v825_v49 = vld [vmem:[#allocation4 + $0x138] sm:$0xff] }
 0x35b   :  { %478 = vmatpush2.msra.mxu0 %v405_v8  ;;  %730 = vmatpush1.msra.mxu1 %v592_v51  ;;  %v567_v8 = vld [vmem:[#allocation2 + $0x8] sm:$0xff]  ;;  %v808_v51 = vld [vmem:[#allocation4 + $0xb0] sm:$0xff] }
 0x35c   :  { %479 = vmatprep.subr.mxu0 %v1160_v14  ;;  %731 = vmatprep.subr.mxu1 %v589_v53  ;;  %v792_v53 = vld [vmem:[#allocation4 + $0x30] sm:$0xff] }
 0x35d   :  { %480 = vmatpush2.msra.mxu0 %v403_v9  ;;  %732 = vmatpush1.msra.mxu1 %v588_v55  ;;  %v569_v9 = vld [vmem:[#allocation2 + $0x18] sm:$0xff]  ;;  %v823_v55 = vld [vmem:[#allocation4 + $0x128] sm:$0xff] }
 0x35e   :  { %481 = vmatprep.subr.mxu0 %v1160_v14  ;;  %v393_v12 = vpop.permute.xlu1 %392  ;;  %733 = vmatprep.subr.mxu1 %v585_v57  ;;  %v806_v57 = vld [vmem:[#allocation4 + $0xa0] sm:$0xff] }
 0x35f   :  { %482 = vmatpush2.msra.mxu0 %v399_v10  ;;  %734 = vmatpush1.msra.mxu1 %v584_v59  ;;  %v566_v10 = vld [vmem:[#allocation2] sm:$0xff] }
 0x360   :  { %483 = vmatprep.subr.mxu0 %v1160_v14  ;;  %735 = vmatprep.subr.mxu1 %v581_v61  ;;  %v790_v59 = vld [vmem:[#allocation4 + $0x20] sm:$0xff]  ;;  %v820_v61 = vld [vmem:[#allocation4 + $0x110] sm:$0xff] }
 0x361   :  { %484 = vmatpush2.msra.mxu0 %v397_v11  ;;  %736 = vmatpush1.msra.mxu1 %v580_v63  ;;  %v568_v11 = vld [vmem:[#allocation2 + $0x10] sm:$0xff]  ;;  %v818_v63 = vld [vmem:[#allocation4 + $0x100] sm:$0xff] }
 0x362   :  { %485 = vmatprep.subr.mxu0 %v1160_v14  ;;  %737 = vmatprep.subr.mxu1 %v577_v1  ;;  %v839_v1 = vld [vmem:[#allocation4 + $0x1a8] sm:$0xff] }
 0x363   :  { %486 = vmatpush2.msra.mxu0 %v393_v12  ;;  %738 = vmatpush1.msra.mxu1 %v576_v3  ;;  %v805_v3 = vld [vmem:[#allocation4 + $0x98] sm:$0xff] }
 0x364   :  { %487 = vmatprep.subr.mxu0 %v1160_v14  ;;  %739 = vmatprep.subr.mxu1 %v573_v5  ;;  %v837_v5 = vld [vmem:[#allocation4 + $0x198] sm:$0xff] }
 0x365   :  { %488 = vmatpush2.msra.mxu0 %v391_v15  ;;  %740 = vmatpush1.msra.mxu1 %v572_v7  ;;  %v788_v7 = vld [vmem:[#allocation4 + $0x10] sm:$0xff] }
 0x366   :  { %490 = vmatmul.mubr.f32.vlgmr.msra.gmra.mxu0 %v340_v13  ;;  %648 = vmatprep.subr.mxu0 %v611_v28  ;;  %v817_v13 = vld [vmem:[#allocation4 + $0xf8] sm:$0xff]  ;;  %v832_v28 = vld [vmem:[#allocation4 + $0x170] sm:$0xff] }
 0x367   :  { %1008 = vmatprep.mubr.msk.f32.mxu0 %vm418_vm2, %v343_v16  ;;  %v416_v23 = vpop.permute.xlu0 %415  ;;  %649 = vmatpush1.msra.mxu0 %v610_v30  ;;  %v815_v30 = vld [vmem:[#allocation4 + $0xe8] sm:$0xff] }
 0x368   :  { %650 = vmatprep.subr.mxu0 %v607_v32  ;;  %741 = vmatprep.subr.mxu1 %v569_v9  ;;  %v799_v32 = vld [vmem:[#allocation4 + $0x68] sm:$0xff] }
 0x369   :  { %651 = vmatpush1.msra.mxu0 %v606_v34  ;;  %742 = vmatpush1.msra.mxu1 %v568_v11  ;;  %v830_v34 = vld [vmem:[#allocation4 + $0x160] sm:$0xff]  ;;  %v803_v9 = vld [vmem:[#allocation4 + $0x88] sm:$0xff] }
 0x36a   :  { %495 = vmatmul.mubr.f32.gmra.mxu0 %v342_v17  ;;  %652 = vmatprep.subr.mxu0 %v603_v36  ;;  %v813_v36 = vld [vmem:[#allocation4 + $0xd8] sm:$0xff]  ;;  %v835_v11 = vld [vmem:[#allocation4 + $0x188] sm:$0xff] }
 0x36b   :  { %704 = vmatprep.mubr.f32.mxu0 %v1160_v14  ;;  %v411_v18 = vpop.permute.xlu1 %410  ;;  %653 = vmatpush1.msra.mxu0 %v602_v38  ;;  %v797_v38 = vld [vmem:[#allocation4 + $0x58] sm:$0xff] }
 0x36c   :  { %654 = vmatprep.subr.mxu0 %v599_v40  ;;  %926 = vmatprep.subr.mxu1 %v1160_v14  ;;  %v828_v40 = vld [vmem:[#allocation4 + $0x150] sm:$0xff] }
 0x36d   :  { %655 = vmatpush1.msra.mxu0 %v598_v42  ;;  %v811_v42 = vld [vmem:[#allocation4 + $0xc8] sm:$0xff] }
 0x36e   :  { %656 = vmatprep.subr.mxu0 %v595_v44  ;;  %v795_v44 = vld [vmem:[#allocation4 + $0x48] sm:$0xff] }
 0x36f   :  { %657 = vmatpush1.msra.mxu0 %v594_v46  ;;  %v826_v46 = vld [vmem:[#allocation4 + $0x140] sm:$0xff] }
 0x370   :  { %658 = vmatprep.subr.mxu0 %v591_v48  ;;  %v809_v48 = vld [vmem:[#allocation4 + $0xb8] sm:$0xff] }
 0x371   :  { %659 = vmatpush1.msra.mxu0 %v590_v50  ;;  %v793_v50 = vld [vmem:[#allocation4 + $0x38] sm:$0xff] }
 0x372   :  { %660 = vmatprep.subr.mxu0 %v587_v52  ;;  %v824_v52 = vld [vmem:[#allocation4 + $0x130] sm:$0xff] }
 0x373   :  { %661 = vmatpush1.msra.mxu0 %v586_v54  ;;  %v807_v54 = vld [vmem:[#allocation4 + $0xa8] sm:$0xff] }
 0x374   :  { %662 = vmatprep.subr.mxu0 %v583_v56  ;;  %v791_v56 = vld [vmem:[#allocation4 + $0x28] sm:$0xff] }
 0x375   :  { %663 = vmatpush1.msra.mxu0 %v582_v58  ;;  %v822_v58 = vld [vmem:[#allocation4 + $0x120] sm:$0xff] }
 0x376   :  { %664 = vmatprep.subr.mxu0 %v579_v60  ;;  %v821_v60 = vld [vmem:[#allocation4 + $0x118] sm:$0xff] }
 0x377   :  { %665 = vmatpush1.msra.mxu0 %v578_v62  ;;  %v819_v62 = vld [vmem:[#allocation4 + $0x108] sm:$0xff] }
 0x378   :  { %666 = vmatprep.subr.mxu0 %v575_v0  ;;  %v840_v0 = vld [vmem:[#allocation4 + $0x1b0] sm:$0x7] }
 0x379   :  { %667 = vmatpush1.msra.mxu0 %v574_v2  ;;  %v838_v2 = vld [vmem:[#allocation4 + $0x1a0] sm:$0xff] }
 0x37a   :  { %668 = vmatprep.subr.mxu0 %v571_v4  ;;  %v789_v4 = vld [vmem:[#allocation4 + $0x18] sm:$0xff] }
 0x37b   :  { %669 = vmatpush1.msra.mxu0 %v570_v6  ;;  %v804_v6 = vld [vmem:[#allocation4 + $0x90] sm:$0xff] }
 0x37c   :  { %670 = vmatprep.subr.mxu0 %v567_v8  ;;  %v836_v8 = vld [vmem:[#allocation4 + $0x190] sm:$0xff] }
 0x37d   :  { %671 = vmatpush1.msra.mxu0 %v566_v10  ;;  %v787_v10 = vld [vmem:[#allocation4 + $0x8] sm:$0xff] }
 0x37e   :  { %1025 = vmatprep.subr.mxu0 %v817_v13  ;;  %v786_v13 = vld [vmem:[#allocation4] sm:$0xff] }
 0x426   :  { %v491_v19 = vpop.f32.mrf.mxu0 }
 0x427   :  { %v492_v20 = vadd.f32 %v491_v19, %v411_v18 }
 0x428   :  { %v493_v21 = vpop.f32.mrf.mxu0 }
 0x429   :  { %v1416_v22 = vmax.f32 %v492_v20, 0.0 }
 0x42a   :  { %v496_v24 = vpop.f32.mrf.mxu0 }
 0x42b   :  { %v497_v25 = vadd.f32 %v496_v24, %v416_v23  ;;  %504 = vrot.lane.b32.xlu1 %v1416_v22, %s1159_s20  ;;  %v833_v24 = vld [vmem:[#allocation4 + $0x178] sm:$0xff] }
 0x42c   :  { %v498_v26 = vpop.f32.mrf.mxu0 }
 0x42d   :  { %v1420_v27 = vmax.f32 %v497_v25, 0.0  ;;  %v801_v25 = vld [vmem:[#allocation4 + $0x78] sm:$0xff] }
 0x42f   :  { %510 = vrot.lane.b32.xlu1 %v1416_v22, %s1158_s19  ;;  %506 = vrot.lane.b32.xlu0 %v1420_v27, %s1159_s20 }
 0x433   :  { %516 = vrot.lane.b32.xlu1 %v1416_v22, %s1156_s18  ;;  %512 = vrot.lane.b32.xlu0 %v1420_v27, %s1158_s19 }
 0x437   :  { %522 = vrot.lane.b32.xlu1 %v1416_v22, %s1155_s0  ;;  %518 = vrot.lane.b32.xlu0 %v1420_v27, %s1156_s18 }
 0x43b   :  { %528 = vrot.lane.b32.xlu1 %v1416_v22, %s1154_s16  ;;  %524 = vrot.lane.b32.xlu0 %v1420_v27, %s1155_s0 }
 0x43f   :  { %530 = vrot.lane.b32.xlu0 %v1420_v27, %s1154_s16 }
 0x464   :  { %534 = vxpose.xlu1.b32.start [1/12] (short) (narrow) %v1416_v22, 8 }
 0x468   :  { %535 = vxpose.xlu1.b32.cont [2/12] (short) (narrow) %v1420_v27, 8  ;;  %v816_v27 = vld [vmem:[#allocation4 + $0xf0] sm:$0xff] }
 0x49d   :  { %v505_v12 = vpop.permute.xlu1 %504 }
 0x49e   :  { %536 = vxpose.xlu1.b32.cont [3/12] (short) (narrow) %v505_v12, 8  ;;  %v802_v12 = vld [vmem:[#allocation4 + $0x80] sm:$0xff] }
 0x4a1   :  { %v507_v15 = vpop.permute.xlu0 %506  ;;  %v511_v16 = vpop.permute.xlu1 %510 }
 0x4a2   :  { %537 = vxpose.xlu1.b32.cont [4/12] (short) (narrow) %v507_v15, 8  ;;  %v834_v15 = vld [vmem:[#allocation4 + $0x180] sm:$0xff] }
 0x4a5   :  { %v513_v17 = vpop.permute.xlu0 %512  ;;  %v517_v18 = vpop.permute.xlu1 %516 }
 0x4a6   :  { %538 = vxpose.xlu1.b32.cont [5/12] (short) (narrow) %v511_v16, 8  ;;  %v616_v16 = vlaneseq }
 0x4a9   :  { %v519_v19 = vpop.permute.xlu0 %518  ;;  %v523_v20 = vpop.permute.xlu1 %522 }
 0x4aa   :  { %539 = vxpose.xlu1.b32.cont [6/12] (short) (narrow) %v513_v17, 8  ;;  %v617_v17 = vshrl.u32 %v616_v16, 7 }
 0x4ad   :  { %v525_v21 = vpop.permute.xlu0 %524  ;;  %v529_v22 = vpop.permute.xlu1 %528 }
 0x4ae   :  { %540 = vxpose.xlu1.b32.cont [7/12] (short) (narrow) %v517_v18, 8  ;;  %v618_v18 = vsub.s32 0, %v617_v17 }
 0x4b1   :  { %v531_v23 = vpop.permute.xlu0 %530 }
 0x4b2   :  { %541 = vxpose.xlu1.b32.cont [8/12] (short) (narrow) %v519_v19, 8  ;;  %v626_v19 = vsub.s32 2, %v617_v17 }
 0x4b6   :  { %542 = vxpose.xlu1.b32.cont [9/12] (short) (narrow) %v523_v20, 8  ;;  %v614_v20 = vld [vmem:[%s1482_s8] sm:$0xf] }
 0x4ba   :  { %543 = vxpose.xlu1.b32.cont [10/12] (short) (narrow) %v525_v21, 8  ;;  %v622_v21 = vsub.s32 1, %v617_v17 }
 0x4be   :  { %544 = vxpose.xlu1.b32.cont [11/12] (short) (narrow) %v529_v22, 8  ;;  %v630_v22 = vsub.s32 3, %v617_v17 }
 0x4c2   :  { %545 = vxpose.xlu1.b32.end [12/12] (short) (narrow) %v531_v23, 8  ;;  %v619_v23 = vrot.slane %v614_v20, %v618_v18 }
 0x512   :  { %v550_v26 = vpop.trf.xlu1 }
 0x513   :  { %1009 = vmatmul.mubr.msk.f32.vlgmr.msra.gmra.mxu0 %vm636_vm3, %v550_v26  ;;  %1010 = vmatmul.mubr.msk.f32.vlgmr.msra.gmra.mxu1 %vm636_vm3, %v550_v26  ;;  %v631_v26 = vrot.slane %v614_v20, %v630_v22 }
 0x514   :  { %927 = vmatpush1.msra.mxu1 %v833_v24  ;;  %1026 = vmatpush3.msra.mxu0 %v801_v25  ;;  %v627_v24 = vrot.slane %v614_v20, %v626_v19  ;;  %v623_v25 = vrot.slane %v614_v20, %v622_v21 }
 0x515   :  { %928 = vmatprep.subr.mxu1 %v1160_v14  ;;  %1027 = vmatprep.subr.mxu0 %v816_v27 }
 0x516   :  { %929 = vmatpush1.msra.mxu1 %v832_v28  ;;  %1028 = vmatpush3.msra.mxu0 %v800_v29 }
 0x517   :  { %930 = vmatprep.subr.mxu1 %v1160_v14  ;;  %1029 = vmatprep.subr.mxu0 %v815_v30 }
 0x518   :  { %931 = vmatpush1.msra.mxu1 %v831_v31  ;;  %1030 = vmatpush3.msra.mxu0 %v799_v32 }
 0x519   :  { %932 = vmatprep.subr.mxu1 %v1160_v14  ;;  %1031 = vmatprep.subr.mxu0 %v814_v33 }
 0x51a   :  { %933 = vmatpush1.msra.mxu1 %v830_v34  ;;  %1032 = vmatpush3.msra.mxu0 %v798_v35 }
 0x51b   :  { %934 = vmatprep.subr.mxu1 %v1160_v14  ;;  %1033 = vmatprep.subr.mxu0 %v813_v36 }
 0x51c   :  { %935 = vmatpush1.msra.mxu1 %v829_v37  ;;  %1034 = vmatpush3.msra.mxu0 %v797_v38 }
 0x51d   :  { %936 = vmatprep.subr.mxu1 %v1160_v14  ;;  %1035 = vmatprep.subr.mxu0 %v812_v39 }
 0x51e   :  { %937 = vmatpush1.msra.mxu1 %v828_v40  ;;  %1036 = vmatpush3.msra.mxu0 %v796_v41  ;;  %v1011_v40 = vld [vmem:[%s1484_s10] ss:$0 sm:$0xff] }
 0x51f   :  { %938 = vmatprep.subr.mxu1 %v1160_v14  ;;  %1037 = vmatprep.subr.mxu0 %v811_v42 }
 0x520   :  { %939 = vmatpush1.msra.mxu1 %v827_v43  ;;  %1038 = vmatpush3.msra.mxu0 %v795_v44 }
 0x521   :  { %940 = vmatprep.subr.mxu1 %v1160_v14  ;;  %1039 = vmatprep.subr.mxu0 %v810_v45 }
 0x522   :  { %941 = vmatpush1.msra.mxu1 %v826_v46  ;;  %1040 = vmatpush3.msra.mxu0 %v794_v47 }
 0x523   :  { %942 = vmatprep.subr.mxu1 %v1160_v14  ;;  %1041 = vmatprep.subr.mxu0 %v809_v48 }
 0x524   :  { %943 = vmatpush1.msra.mxu1 %v825_v49  ;;  %1042 = vmatpush3.msra.mxu0 %v793_v50 }
 0x525   :  { %944 = vmatprep.subr.mxu1 %v1160_v14  ;;  %1043 = vmatprep.subr.mxu0 %v808_v51 }
 0x526   :  { %945 = vmatpush1.msra.mxu1 %v824_v52  ;;  %1044 = vmatpush3.msra.mxu0 %v792_v53 }
 0x527   :  { %946 = vmatprep.subr.mxu1 %v1160_v14  ;;  %1045 = vmatprep.subr.mxu0 %v807_v54 }
 0x528   :  { %947 = vmatpush1.msra.mxu1 %v823_v55  ;;  %1046 = vmatpush3.msra.mxu0 %v791_v56 }
 0x529   :  { %948 = vmatprep.subr.mxu1 %v1160_v14  ;;  %1047 = vmatprep.subr.mxu0 %v806_v57 }
 0x52a   :  { %949 = vmatpush1.msra.mxu1 %v822_v58  ;;  %1048 = vmatpush3.msra.mxu0 %v790_v59 }
 0x52b   :  { %950 = vmatprep.subr.mxu1 %v1160_v14  ;;  %1049 = vmatprep.subr.mxu0 %v805_v3 }
 0x52c   :  { %951 = vmatpush1.msra.mxu1 %v821_v60  ;;  %1050 = vmatpush3.msra.mxu0 %v789_v4 }
 0x52d   :  { %952 = vmatprep.subr.mxu1 %v1160_v14  ;;  %1051 = vmatprep.subr.mxu0 %v804_v6 }
 0x52e   :  { %953 = vmatpush1.msra.mxu1 %v820_v61  ;;  %1052 = vmatpush3.msra.mxu0 %v788_v7 }
 0x52f   :  { %954 = vmatprep.subr.mxu1 %v1160_v14  ;;  %1053 = vmatprep.subr.mxu0 %v803_v9 }
 0x530   :  { %955 = vmatpush1.msra.mxu1 %v819_v62  ;;  %1054 = vmatpush3.msra.mxu0 %v787_v10 }
 0x531   :  { %956 = vmatprep.subr.mxu1 %v1160_v14  ;;  %1055 = vmatprep.subr.mxu0 %v802_v12 }
 0x532   :  { %957 = vmatpush1.msra.mxu1 %v818_v63  ;;  %1056 = vmatpush3.msra.mxu0 %v786_v13 }
 0x533   :  { %976 = vmatprep.subr.mxu1 %v1160_v14 }
 0x534   :  { %1012 = vmatpush2.msk.msra.mxu1 %vm852_vm4, %v840_v0 }
 0x535   :  { %978 = vmatprep.subr.mxu1 %v1160_v14 }
 0x536   :  { %979 = vmatpush2.msra.mxu1 %v839_v1 }
 0x537   :  { %980 = vmatprep.subr.mxu1 %v1160_v14 }
 0x538   :  { %981 = vmatpush2.msra.mxu1 %v838_v2 }
 0x539   :  { %982 = vmatprep.subr.mxu1 %v1160_v14 }
 0x53a   :  { %983 = vmatpush2.msra.mxu1 %v837_v5 }
 0x53b   :  { %984 = vmatprep.subr.mxu1 %v1160_v14 }
 0x53c   :  { %985 = vmatpush2.msra.mxu1 %v836_v8 }
 0x53d   :  { %986 = vmatprep.subr.mxu1 %v1160_v14 }
 0x53e   :  { %987 = vmatpush2.msra.mxu1 %v835_v11 }
 0x53f   :  { %988 = vmatprep.subr.mxu1 %v1160_v14 }
 0x540   :  { %989 = vmatpush2.msra.mxu1 %v834_v15 }
 0x5d3   :  { %v706_v27 = vpop.f32.mrf.mxu0  ;;  %v777_v28 = vpop.f32.mrf.mxu1 }
 0x5d4   :  { %v707_v14 = vadd.f32 %v706_v27, %v619_v23  ;;  %v778_v29 = vadd.f32 %v777_v28, %v627_v24 }
 0x5d5   :  { %v708_v30 = vpop.f32.mrf.mxu0  ;;  %v779_v31 = vpop.f32.mrf.mxu1 }
 0x5d6   :  { %v709_v32 = vadd.f32 %v708_v30, %v623_v25  ;;  %v780_v33 = vadd.f32 %v779_v31, %v631_v26  ;;  %v782_v36 = vmax.f32 %v707_v14, 0.0  ;;  %v784_v37 = vmax.f32 %v778_v29, 0.0 }
 0x5d8   :  { %v783_v34 = vmax.f32 %v709_v32, 0.0  ;;  %v785_v35 = vmax.f32 %v780_v33, 0.0 }
 0x5da   :  { %920 = vmatprep.mubr.f32.mxu0 %v783_v34  ;;  %1013 = vmatprep.mubr.msk.f32.mxu1 %vm848_vm5, %v785_v35 }
 0x5db   :  { %921 = vmatmul.mubr.f32.vlgmr.msra.gmra.mxu0 %v782_v36  ;;  %991 = vmatmul.mubr.f32.vlgmr.msra.gmra.mxu1 %v784_v37 }
 0x69b   :  { %v1057_v38 = vpop.f32.mrf.mxu0  ;;  %v992_v39 = vpop.f32.mrf.mxu1 }
 0x69d   :  { %v1058_v41 = vpop.f32.mrf.mxu0  ;;  %v994_v42 = vpop.f32.mrf.mxu1 }
 0x69e   :  { %v1059_v43 = vadd.f32 %v1058_v41, %v1057_v38 }
 0x6a0   :  { %v923_v44 = vadd.f32 %v1059_v43, %v1011_v40 }
 0x6a2   :  { %v993_v45 = vadd.f32 %v992_v39, %v923_v44 }
 0x6a4   :  { %996 = vst [vmem:[%s1485_s11] sm:$0x3] %v993_v45 }
 0x6a5   :  { %1001 = vsyncpa [#allocation3], 1 }
 0x6a6   :  { %1002 = vsyncpa [#allocation5], 1 }

</bundles_post_ra>
